<compile_context>
chip_gen: v7x
topology: tpu7x:2x2x1
jax: 0.10.0
libtpu: 0.0.40
codegen_flags: <defaults>
</compile_context>

<pallas_src>
import functools

import jax
import jax.numpy as jnp
from jax.experimental import pallas as pl
from jax.experimental.pallas import tpu as pltpu


def _round_up8(n):
    return ((n + 7) // 8) * 8


def _critic_kernel(x_ref, p_ref, o_ref, *, zdim, h, q, offs, last_row):
    # x_ref holds a sublane-aligned block of rows that contains the last row.
    x = x_ref[last_row:last_row + 1, :].astype(jnp.float32)        # (1, zdim)

    o1, o2, o3, o4 = offs

    # ---- shared: Linear -> Tanh -> Linear -> Tanh (single row) ----
    w1 = p_ref[o1:o1 + zdim, :]                                    # (zdim, h)
    b1 = p_ref[o1 + zdim:o1 + zdim + 1, :]                         # (1, h)
    h1 = jnp.tanh(jnp.dot(x, w1, preferred_element_type=jnp.float32) + b1)

    w2 = p_ref[o2:o2 + h, :]                                       # (h, h)
    b2 = p_ref[o2 + h:o2 + h + 1, :]                                # (1, h)
    h2 = jnp.tanh(jnp.dot(h1, w2, preferred_element_type=jnp.float32) + b2)

    # ---- critic: Linear -> ReLU ----
    w3 = p_ref[o3:o3 + h, :q]                                      # (h, q)
    b3 = p_ref[o3 + h:o3 + h + 1, :q]                              # (1, q)
    h3 = jnp.maximum(
        jnp.dot(h2, w3, preferred_element_type=jnp.float32) + b3, 0.0)

    # ---- critic: Linear(q -> 1), done on the VPU + XLU lane reduce ----
    w4_row = p_ref[o4:o4 + 1, :q]                                  # (1, q)
    b4 = p_ref[o4 + 1:o4 + 2, 0:1]                                 # (1, 1)
    out = jnp.sum(h3 * w4_row, axis=-1, keepdims=True) + b4        # (1, 1)

    o_ref[...] = out


def pack_params(params):
    """Pack the 8 parameter tensors into ONE contiguous slab (done once).

    Slab shape: (rows, h) float32, every section starting on a multiple of 8:
      rows [o1, o1+zdim)   = w1       row o1+zdim     = b1
      rows [o2, o2+h)      = w2       row o2+h        = b2
      rows [o3, o3+h)[:q]  = w3       row o3+h [:q]   = b3
      row   o4 [:q]        = w4.T     row o4+1 [0]    = b4
    """
    (w1, b1, w2, b2, w3, b3, w4, b4) = params
    zdim, h = w1.shape
    q = w3.shape[1]

    o1 = 0
    o2 = _round_up8(o1 + zdim + 1)
    o3 = _round_up8(o2 + h + 1)
    o4 = _round_up8(o3 + h + 1)
    total = _round_up8(o4 + 2)

    slab = jnp.zeros((total, h), jnp.float32)
    slab = slab.at[o1:o1 + zdim, :].set(w1)
    slab = slab.at[o1 + zdim, :].set(b1[0])
    slab = slab.at[o2:o2 + h, :].set(w2)
    slab = slab.at[o2 + h, :].set(b2[0])
    slab = slab.at[o3:o3 + h, :q].set(w3)
    slab = slab.at[o3 + h, :q].set(b3[0])
    slab = slab.at[o4, :q].set(w4[:, 0])
    slab = slab.at[o4 + 1, 0].set(b4[0, 0])
    return slab, (o1, o2, o3, o4)


def critic_forward(x, packed):
    """x: (seq, zdim) float32. Returns array of shape (1,) like PyTorch."""
    slab, offs = packed
    seq, zdim = x.shape
    h = slab.shape[1]
    q = ((zdim // 2) // 2)

    # Sublane-aligned block of x containing the last row: only 8 rows (or the
    # whole array when seq isn't a multiple of 8) are DMA'd, selected by the
    # index_map -- no wrapper-side slice / HBM intermediate.
    if seq % 8 == 0:
        blk_rows = 8
        blk_idx = seq // 8 - 1
        last_row = 7
    else:
        blk_rows = seq
        blk_idx = 0
        last_row = seq - 1

    kernel = functools.partial(
        _critic_kernel, zdim=zdim, h=h, q=q, offs=offs, last_row=last_row)

    vmem_whole = pl.BlockSpec(memory_space=pltpu.MemorySpace.VMEM)
    out = pl.pallas_call(
        kernel,
        out_shape=jax.ShapeDtypeStruct((1, 1), jnp.float32),
        in_specs=[
            pl.BlockSpec((blk_rows, zdim), lambda: (blk_idx, 0)),  # x block
            vmem_whole,                                            # param slab
        ],
        out_specs=vmem_whole,
    )(x, slab)
    return out.reshape((1,))


def init_params(key, zdim):
    """Deterministic parameter init (PyTorch-style uniform(-1/sqrt(fan_in), ...))."""
    h = zdim // 2
    q = h // 2

    def linear(key, fan_in, fan_out):
        kw, kb = jax.random.split(key)
        bound = 1.0 / jnp.sqrt(fan_in)
        w = jax.random.uniform(kw, (fan_in, fan_out), jnp.float32, -bound, bound)
        b = jax.random.uniform(kb, (1, fan_out), jnp.float32, -bound, bound)
        return w, b

    k1, k2, k3, k4 = jax.random.split(key, 4)
    w1, b1 = linear(k1, zdim, h)   # shared.0
    w2, b2 = linear(k2, h, h)      # shared.2
    w3, b3 = linear(k3, h, q)      # critic.0
    w4, b4 = linear(k4, q, 1)      # critic.2
    return (w1, b1, w2, b2, w3, b3, w4, b4)


def critic_reference(x, params):
    """Pure-JAX reference for sanity checking (unpacked params)."""
    (w1, b1, w2, b2, w3, b3, w4, b4) = params
    hh = jnp.tanh(x @ w1 + b1[0])
    hh = jnp.tanh(hh @ w2 + b2[0])
    last = hh[-1]
    h3 = jnp.maximum(last @ w3 + b3[0], 0.0)
    return h3 @ w4 + b4[0]


if __name__ == "__main__":
    zdim = 32
    seq = 8

    key = jax.random.PRNGKey(0)
    k_params, k_x = jax.random.split(key)
    params = init_params(k_params, zdim)
    packed = pack_params(params)
    x = jax.random.normal(k_x, (seq, zdim), dtype=jnp.float32)

    out = critic_forward(x, packed)
    out = jax.block_until_ready(out)

    ref = critic_reference(x, params)
    assert out.shape == (1,), out.shape
    assert jnp.allclose(out, ref, atol=1e-5, rtol=1e-5), (out, ref)

    print("KERNEL_OK")
</pallas_src>

<mosaic_0001>
module attributes {stable_mosaic.version = 11 : i64} {
  func.func @_critic_kernel(%arg0: memref<8x32xf32, #tpu.memory_space<vmem>>, %arg1: memref<96x16xf32, #tpu.memory_space<vmem>>, %arg2: memref<1x1xf32, #tpu.memory_space<vmem>>) attributes {dimension_semantics = [], scalar_prefetch = 0 : i64, scratch_operands = 0 : i64, tpu.core_type = #tpu.core_type<tc>} {
    %c7 = arith.constant 7 : index
    %c0 = arith.constant 0 : index
    %0 = vector.load %arg0[%c7, %c0] : memref<8x32xf32, #tpu.memory_space<vmem>>, vector<1x32xf32>
    %c0_0 = arith.constant 0 : index
    %c0_1 = arith.constant 0 : index
    %1 = vector.load %arg1[%c0_0, %c0_1] : memref<96x16xf32, #tpu.memory_space<vmem>>, vector<32x16xf32>
    %c32 = arith.constant 32 : index
    %c0_2 = arith.constant 0 : index
    %2 = vector.load %arg1[%c32, %c0_2] : memref<96x16xf32, #tpu.memory_space<vmem>>, vector<1x16xf32>
    %cst = arith.constant dense<0.000000e+00> : vector<1x16xf32>
    %3 = tpu.matmul %0, %1, %cst {dimension_numbers = #tpu.dot_dimension_numbers<[1], [0], [0], [1], [0, 0, 1, 1], [], []>} : vector<1x32xf32>, vector<32x16xf32>, vector<1x16xf32> -> vector<1x16xf32>
    %4 = arith.addf %3, %2 : vector<1x16xf32>
    %5 = math.tanh %4 : vector<1x16xf32>
    %c40 = arith.constant 40 : index
    %c0_3 = arith.constant 0 : index
    %6 = vector.load %arg1[%c40, %c0_3] : memref<96x16xf32, #tpu.memory_space<vmem>>, vector<16x16xf32>
    %c56 = arith.constant 56 : index
    %c0_4 = arith.constant 0 : index
    %7 = vector.load %arg1[%c56, %c0_4] : memref<96x16xf32, #tpu.memory_space<vmem>>, vector<1x16xf32>
    %cst_5 = arith.constant dense<0.000000e+00> : vector<1x16xf32>
    %8 = tpu.matmul %5, %6, %cst_5 {dimension_numbers = #tpu.dot_dimension_numbers<[1], [0], [0], [1], [0, 0, 1, 1], [], []>} : vector<1x16xf32>, vector<16x16xf32>, vector<1x16xf32> -> vector<1x16xf32>
    %9 = arith.addf %8, %7 : vector<1x16xf32>
    %10 = math.tanh %9 : vector<1x16xf32>
    %c64 = arith.constant 64 : index
    %c0_6 = arith.constant 0 : index
    %11 = vector.load %arg1[%c64, %c0_6] : memref<96x16xf32, #tpu.memory_space<vmem>>, vector<16x8xf32>
    %c80 = arith.constant 80 : index
    %c0_7 = arith.constant 0 : index
    %12 = vector.load %arg1[%c80, %c0_7] : memref<96x16xf32, #tpu.memory_space<vmem>>, vector<1x8xf32>
    %cst_8 = arith.constant dense<0.000000e+00> : vector<1x8xf32>
    %13 = tpu.matmul %10, %11, %cst_8 {dimension_numbers = #tpu.dot_dimension_numbers<[1], [0], [0], [1], [0, 0, 1, 1], [], []>} : vector<1x16xf32>, vector<16x8xf32>, vector<1x8xf32> -> vector<1x8xf32>
    %14 = arith.addf %13, %12 : vector<1x8xf32>
    %cst_9 = arith.constant 0.000000e+00 : f32
    %15 = vector.broadcast %cst_9 : f32 to vector<1x8xf32>
    %16 = arith.maximumf %14, %15 : vector<1x8xf32>
    %c88 = arith.constant 88 : index
    %c0_10 = arith.constant 0 : index
    %17 = vector.load %arg1[%c88, %c0_10] : memref<96x16xf32, #tpu.memory_space<vmem>>, vector<1x8xf32>
    %c89 = arith.constant 89 : index
    %c0_11 = arith.constant 0 : index
    %18 = vector.load %arg1[%c89, %c0_11] : memref<96x16xf32, #tpu.memory_space<vmem>>, vector<1x1xf32>
    %19 = arith.mulf %16, %17 : vector<1x8xf32>
    %cst_12 = arith.constant dense<0.000000e+00> : vector<1xf32>
    %20 = vector.multi_reduction <add>, %19, %cst_12 [1] : vector<1x8xf32> to vector<1xf32>
    %21 = vector.shape_cast %20 : vector<1xf32> to vector<1x1xf32>
    %22 = arith.addf %21, %18 : vector<1x1xf32>
    %c0_13 = arith.constant 0 : index
    %c0_14 = arith.constant 0 : index
    %23 = vector.load %arg2[%c0_13, %c0_14] : memref<1x1xf32, #tpu.memory_space<vmem>>, vector<1x1xf32>
    tpu.vector_store %arg2[%c0_13, %c0_14], %22 {strides = array<i32>} : memref<1x1xf32, #tpu.memory_space<vmem>>, vector<1x1xf32>,
    return
  }
}

</mosaic_0001>

<bundles_post_ra>
// kernel: tpu_custom_call.1
= control target key start
LH: loop header
LB: loop body
LE: loop exit
PB: predicated region body
PF: predicated region fallthrough
CT: control target
= control target key end

     0   :  { %v355_v3 = vmov 0.0|0.0   ;;  %vm356_vm0 = vmmov 0   ;;  %v357_v6 = vmov 0.0   ;;  %s431_s0 = inlined_call_operand.vmem [shape: f32[8,32], index: 0, kind: input, shape index: {}]   ;;  %s432_s1 = inlined_call_operand.vmem [shape: f32[96,16], index: 1, kind: input, shape index: {}]   ;;  %s433_s2 = inlined_call_operand.hbm [shape: f32[1,1], index: 2, kind: output, shape index: {}]  }
   0x1   :  { %v13_v0 = vld [vmem:[%s432_s1] sm:$0xff]  ;;  %v14_v1 = vld [vmem:[%s432_s1 + $0x8] sm:$0xff]  ;;  %v15_v2 = vld [vmem:[%s432_s1 + $0x10] sm:$0xff]  ;;  %311 = vmatprep.subr.bf16.mxu0 %v355_v3  ;;  %294 = vmatprep.mubr.msk.f32.mxu0 %vm356_vm0, %v357_v6 }
   0x2   :  { %v312_v4 = vpack.c.bf16 %v14_v1, %v13_v0  ;;  %v16_v5 = vld [vmem:[%s432_s1 + $0x18] sm:$0xff]  ;;  %317 = vmatprep.subr.bf16.mxu1 %v355_v3  ;;  %301 = vmatprep.mubr.msk.f32.mxu1 %vm356_vm0, %v357_v6 }
   0x3   :  { %7 = vsyncpa [#allocation3], 0  ;;  %v315_v7 = vpack.c.bf16 %v16_v5, %v15_v2  ;;  %v12_v8 = vld [vmem:[%s431_s0 + $0x7] sm:$0x1]  ;;  %vm18_vm1 = vcmask 261120   ;;  %v93_v9 = vld [vmem:[%s432_s1 + $0x28] sm:$0xff] }
   0x4   :  { %313 = vmatpush3.bf16.msra.mxu0 %v312_v4  ;;  %v94_v10 = vld [vmem:[%s432_s1 + $0x30] sm:$0xff]  ;;  %v17_v12 = vld [vmem:[%s432_s1 + $0x20] sm:$0x1]  ;;  %vm96_vm2 = vcmask 130048   ;;  %v172_v18 = vld [vmem:[%s432_s1 + $0x48] sm:$0xff]  ;;  %vm251_vm3 = vcmask 57344  }
   0x5   :  { %314 = vmatprep.subr.bf16.mxu0 %v355_v3  ;;  %v318_v11 = vpack.c.bf16 %v94_v10, %v93_v9  ;;  %v171_v17 = vld [vmem:[%s432_s1 + $0x40] sm:$0xff]  ;;  %v95_v20 = vld [vmem:[%s432_s1 + $0x38] sm:$0x1]  ;;  %v173_v25 = vld [vmem:[%s432_s1 + $0x50] sm:$0x1]  ;;  %s358_s8 = smov [#allocation2]  }
   0x6   :  { %v321_v19 = vpack.c.bf16 %v172_v18, %v171_v17  ;;  %v248_v29 = vld [vmem:[%s432_s1 + $0x58] sm:$0x1]  ;;  %v249_v33 = vld [vmem:[%s432_s1 + $0x59] sm:$0x1]  ;;  %s264_s9 = sshll.u32 %s358_s8, 4  ;;  %vm256_vm4 = vcmask 0   ;;  %s265_s9 = int_to_ptr.vmem [resolvable:$true] %s264_s9 }
   0x7   :  { %319 = vmatpush3.bf16.msra.mxu1 %v318_v11  ;;  %s331_s10 = scalar_lea.vmem %s265_s9, 16  ;;  %s335_s11 = scalar_lea.vmem %s265_s9, 32 }
   0x8   :  { %316 = vmatpush3.bf16.msra.mxu0 %v315_v7  ;;  %320 = vmatprep.subr.bf16.mxu1 %v355_v3  ;;  %p332_p0 = scmp.ne.s32.totalorder %s265_s9, %s331_s10  ;;  %p336_p1 = scmp.lt.s32.totalorder %s265_s9, %s265_s9 }
   0x9   :  { %p337_p2 = scmp.lt.s32.totalorder %s335_s11, %s331_s10 }
   0xb   :  { %295 = vmatmul.mubr.msk.f32.vlgmr.msra.gmra.mrb[0].mxu0 %vm18_vm1, %v12_v8  ;;  %p338_p3 = por %p337_p2, %p336_p1 }
   0xd   :  { %p339_p4 = pnand %p338_p3, %p332_p0 }
  0xde   :  { %v88_v13 = vpop.f32.mrb[0].mxu0 }
  0xdf   :  { %v89_v14 = vadd.f32 %v88_v13, %v17_v12  ;;  %v296_v15 = vpop.f32.mrb[1].mxu0 }
  0xe1   :  { %327 = vtanh.f32 %v89_v14 }
  0xeb   :  { %v328_v16 = vpop.eup %327 }
  0xec   :  { %302 = vmatmul.mubr.msk.f32.vlgmr.msra.gmra.mrb[0].mxu1 %vm96_vm2, %v328_v16 }
  0xed   :  { %308 = vmatprep.mubr.msk.f32.mxu1 %vm356_vm0, %v357_v6  ;;  %322 = vmatpush3.bf16.msra.mxu1 %v321_v19 }
 0x1bf   :  { %v166_v21 = vpop.f32.mrb[0].mxu1 }
 0x1c0   :  { %v167_v22 = vadd.f32 %v166_v21, %v95_v20  ;;  %v303_v23 = vpop.f32.mrb[1].mxu1 }
 0x1c2   :  { %329 = vtanh.f32 %v167_v22 }
 0x1cc   :  { %v330_v24 = vpop.eup %329 }
 0x1cd   :  { %309 = vmatmul.mubr.msk.f32.vlgmr.msra.gmra.mrb[2].mxu1 %vm96_vm2, %v330_v24 }
 0x2a0   :  { %v243_v26 = vpop.f32.mrb[2].mxu1 }
 0x2a1   :  { %v244_v27 = vadd.f32 %v243_v26, %v173_v25  ;;  %v310_v28 = vpop.f32.mrb[3].mxu1 }
 0x2a3   :  { %v247_v30 = vmax.f32 %v244_v27, 0.0 }
 0x2a5   :  { %v250_v31 = vmul.f32 %v248_v29, %v247_v30 }
 0x2a7   :  { %v252_v32 = vsel %vm251_vm3, %v250_v31, 0.0 }
 0x2a8   :  { %253 = vadd.xlane.f32.xlu0 %v252_v32 }
 0x335   :  { %v254_v34 = vpop.xlane.xlu0 %253 }
 0x336   :  { %v255_v35 = vadd.f32 %v254_v34, %v249_v33 }
 0x338   :  { %257 = vst.msk [vmem:[#allocation2] sm:$0x1] %vm256_vm4, %v255_v35 }
 0x339   :  { %342 = shalt.err (!%p339_p4)
}
 0x33a   :  { %s343_s14 = scalar_lea.hbm %s433_s2, 16 }
 0x33b   :  { %p344_p5 = scmp.ne.s32.totalorder %s433_s2, %s343_s14  ;;  %p347_p6 = scmp.lt.u32.totalorder %s343_s14, %s433_s2 }
 0x33d   :  { %p349_p7 = pnand %p347_p6, %p344_p5 }
 0x33f   :  { %352 = shalt.err (!%p349_p7)
}
 0x340   :  { %267 = dma.vmem_to_hbm [thread:$0]  %s265_s9, 16, %s433_s2, [#allocation3]  }
 0x341   :  { %353 = dma.done.wait [#allocation3], 16  }
 0x342   :  { %354 = vsyncadd [#allocation3], 4294967280 }
 0x343   :  { %271 = vsyncpa [#allocation3], 1 }

</bundles_post_ra>
